<compile_context>
chip_gen: v6e
topology: v6e:2x2x1
jax: 0.10.0
libtpu: 0.0.40
codegen_flags: <defaults>
</compile_context>

<pallas_src>
import jax
import jax.numpy as jnp
from jax.experimental import pallas as pl
from jax.experimental.pallas import tpu as pltpu

_LANE = 128
_TARGET_BLOCK_BYTES = 2 * 1024 * 1024   # ~2 MiB per block regardless of dtype
_MIN_SPLIT_BYTES = 64 * 1024            # don't split into steps smaller than this
_VMEM_LIMIT_BYTES = 32 * 1024 * 1024    # safe on all generations incl. v7x (64 MiB)


def _device_kind() -> str:
    try:
        return jax.devices()[0].device_kind.lower()
    except Exception:
        return ""


def _min_grid_steps() -> int:
    # v7x has 2 TensorCores/chip -> give each >=2 parallel steps (even split).
    # v5e/v6e have 1 TC: the grid is a serial loop, so 3 steps is just enough
    # to pipeline the in/out DMAs without paying extra per-step overhead.
    return 4 if "v7" in _device_kind() else 3


def _compute_dtype(io_dtype):
    io_dtype = jnp.dtype(io_dtype)
    if io_dtype == jnp.dtype(jnp.float32):
        return jnp.float32
    if io_dtype == jnp.dtype(jnp.bfloat16):
        # v5e and older lack bf16 VPU/EUP -> compute in f32 there.
        if any(t in _device_kind() for t in ("v2", "v3", "v4", "v5")):
            return jnp.float32
        return jnp.dtype(jnp.bfloat16)
    return jnp.float32


def _make_kernel(compute_dtype):
    def kernel(x_ref, o_ref):
        # Reference forward: ones.div((-s).exp()) == 1 / exp(-s) == exp(s).
        # Single transcendental per element -> lands in the EUP slot.
        x = x_ref[...].astype(compute_dtype)
        o_ref[...] = jnp.exp(x).astype(o_ref.dtype)
    return kernel


def sigmoid_forward(x: jax.Array) -> jax.Array:
    """Pallas-TPU implementation of the module's Sigmoid.forward (== exp(x))."""
    orig_shape = x.shape
    orig_dtype = x.dtype
    compute_dtype = _compute_dtype(orig_dtype)

    flat = x.reshape(-1)
    n = flat.shape[0]
    itemsize = jnp.dtype(orig_dtype).itemsize

    # Lane-divisible main part goes through the kernel; the (<128-element)
    # tail, if any, is computed with plain jnp (no full-tensor pad/slice).
    n_main = (n // _LANE) * _LANE

    if n_main == 0:
        out = jnp.exp(flat.astype(compute_dtype)).astype(orig_dtype)
        return out.reshape(orig_shape)

    main = flat if n_main == n else flat[:n_main]
    rows = n_main // _LANE
    x2d = main.reshape(rows, _LANE)

    # Sublane granularity for native-dtype tiling: f32 -> 8, bf16 -> 16, i8 -> 32.
    min_sublane = 8 * max(1, 4 // max(1, itemsize))
    # ~2 MiB blocks, dtype-scaled so bf16/int8 blocks keep the same byte size.
    max_block_rows = max(min_sublane, _TARGET_BLOCK_BYTES // (_LANE * itemsize))
    max_block_rows = (max_block_rows // min_sublane) * min_sublane

    # Prefer the biggest block that fits; only split when the tensor is large
    # enough that each step still moves a useful amount of data.
    block_rows = min(rows, max_block_rows)
    steps = pl.cdiv(rows, block_rows)
    min_steps = _min_grid_steps()
    if steps < min_steps:
        candidate = pl.cdiv(pl.cdiv(rows, min_steps), min_sublane) * min_sublane
        if candidate * _LANE * itemsize >= _MIN_SPLIT_BYTES:
            block_rows = candidate
            steps = pl.cdiv(rows, block_rows)
    grid = (steps,)

    cost = pl.CostEstimate(
        flops=n_main,
        transcendentals=n_main,
        bytes_accessed=2 * n_main * itemsize,
    )

    out2d = pl.pallas_call(
        _make_kernel(compute_dtype),
        out_shape=jax.ShapeDtypeStruct((rows, _LANE), orig_dtype),
        grid_spec=pltpu.PrefetchScalarGridSpec(
            num_scalar_prefetch=0,
            grid=grid,
            in_specs=[pl.BlockSpec((block_rows, _LANE), lambda i: (i, 0))],
            out_specs=pl.BlockSpec((block_rows, _LANE), lambda i: (i, 0)),
        ),
        compiler_params=pltpu.CompilerParams(
            dimension_semantics=("parallel",),
            vmem_limit_bytes=_VMEM_LIMIT_BYTES,
        ),
        cost_estimate=cost,
    )(x2d)

    out_flat = out2d.reshape(-1)
    if n_main != n:
        tail = jnp.exp(flat[n_main:].astype(compute_dtype)).astype(orig_dtype)
        out_flat = jnp.concatenate([out_flat, tail])
    return out_flat.reshape(orig_shape)


if __name__ == "__main__":
    key = jax.random.PRNGKey(0)
    # Small NCHW input consistent with the conv-net project this module sits in.
    x = jax.random.normal(key, (2, 4, 16, 16), dtype=jnp.float32)

    y = sigmoid_forward(x)
    jax.block_until_ready(y)

    # Reference: exact semantics of the PyTorch forward, ones.div((-s).exp()).
    y_ref = 1.0 / jnp.exp(-x)
    assert y.shape == x.shape and y.dtype == x.dtype
    assert jnp.allclose(y, y_ref, rtol=1e-5, atol=1e-6)

    # Also exercise a non-lane-divisible size to cover the tail path.
    x2 = jax.random.normal(jax.random.PRNGKey(1), (3, 5, 7), dtype=jnp.float32)
    y2 = sigmoid_forward(x2)
    jax.block_until_ready(y2)
    assert jnp.allclose(y2, 1.0 / jnp.exp(-x2), rtol=1e-5, atol=1e-6)

    print("KERNEL_OK")
</pallas_src>

<mosaic_0001>
module attributes {stable_mosaic.version = 11 : i64} {
  func.func @kernel(%arg0: i32, %arg1: memref<16x128xf32, #tpu.memory_space<vmem>>, %arg2: memref<16x128xf32, #tpu.memory_space<vmem>>) attributes {dimension_semantics = [#tpu.dimension_semantics<parallel>], iteration_bounds = array<i64: 1>, scalar_prefetch = 0 : i64, scratch_operands = 0 : i64, tpu.core_type = #tpu.core_type<tc>, window_params = [{transform_indices = @transform_0, window_bounds = array<i64: 16, 128>}, {transform_indices = @transform_1, window_bounds = array<i64: 16, 128>}]} {
    %c0 = arith.constant 0 : index
    %c0_0 = arith.constant 0 : index
    %0 = vector.load %arg1[%c0, %c0_0] : memref<16x128xf32, #tpu.memory_space<vmem>>, vector<16x128xf32>
    %1 = math.exp %0 : vector<16x128xf32>
    %c0_1 = arith.constant 0 : index
    %c0_2 = arith.constant 0 : index
    %2 = vector.load %arg2[%c0_1, %c0_2] : memref<16x128xf32, #tpu.memory_space<vmem>>, vector<16x128xf32>
    tpu.vector_store %arg2[%c0_1, %c0_2], %1 {strides = array<i32>} : memref<16x128xf32, #tpu.memory_space<vmem>>, vector<16x128xf32>,
    return
  }
  func.func @transform_0(%arg0: i32) -> (i32, i32) {
    %c0_i32 = arith.constant 0 : i32
    %c0_i32_0 = arith.constant 0 : i32
    return %arg0, %c0_i32 : i32, i32
  }
  func.func @transform_1(%arg0: i32) -> (i32, i32) {
    %c0_i32 = arith.constant 0 : i32
    %c0_i32_0 = arith.constant 0 : i32
    return %arg0, %c0_i32 : i32, i32
  }
}

</mosaic_0001>

<bundles_post_ra>
// kernel: tpu_custom_call.1
= control target key start
LH: loop header
LB: loop body
LE: loop exit
PB: predicated region body
PF: predicated region fallthrough
CT: control target
= control target key end

     0   :  { %6 = vsyncpa [#allocation3], 0  ;;  %s120_s0 = inlined_call_operand.hbm [shape: f32[16,128], index: 0, kind: input, shape index: {}]   ;;  %s121_s1 = inlined_call_operand.hbm [shape: f32[16,128], index: 1, kind: output, shape index: {}]  }
   0x1   :  { %7 = vsyncpa [#allocation4], 0  ;;  %s100_s6 = smov [#allocation2]  }
   0x2   :  { %s13_s7 = sshll.u32 %s100_s6, 4  ;;  %s14_s7 = int_to_ptr.vmem [resolvable:$true] %s13_s7 }
   0x3   :  { %s64_s8 = scalar_lea.vmem %s14_s7, 256  ;;  %p69_p1 = scmp.lt.s32.totalorder %s14_s7, %s14_s7 }
   0x4   :  { %p65_p0 = scmp.ne.s32.totalorder %s14_s7, %s64_s8  ;;  %p70_p2 = scmp.lt.s32.totalorder %s64_s8, %s64_s8 }
   0x6   :  { %p71_p3 = por %p70_p2, %p69_p1 }
   0x8   :  { %p72_p4 = pnand %p71_p3, %p65_p0 }
   0xa   :  { %75 = shalt.err (!%p72_p4)
}
   0xb   :  { %s101_s9 = smov 128   ;;  %s102_s10 = smov 8  }
   0xc   :  { %19 = dma.hbm_to_vmem [thread:$0]  %s120_s0, 256, %s14_s7, [#allocation3], %s101_s9, %s101_s9, %s102_s10  }
   0xd   :  { %96 = dma.done.wait [#allocation3], 256  }
   0xe   :  { %97 = vsyncadd [#allocation3], 4294967040  ;;  %v23_v0 = vld [vmem:[#allocation2] sm:$0xff]  ;;  %v24_v1 = vld [vmem:[#allocation2 + $0x8] sm:$0xff]  ;;  %s103_s13 = smov [#allocation5]  }
   0xf   :  { %v25_v2 = vmul.f32 1.442695, %v23_v0  ;;  %v27_v3 = vmul.f32 1.442695, %v24_v1  ;;  %s36_s14 = sshll.u32 %s103_s13, 4  ;;  %s37_s14 = int_to_ptr.vmem [resolvable:$true] %s36_s14 }
  0x10   :  { %s76_s15 = scalar_lea.vmem %s37_s14, 256  ;;  %p81_p6 = scmp.lt.s32.totalorder %s37_s14, %s37_s14 }
  0x11   :  { %52 = vpow2.f32 %v25_v2  ;;  %p77_p5 = scmp.ne.s32.totalorder %s37_s14, %s76_s15  ;;  %p82_p7 = scmp.lt.s32.totalorder %s76_s15, %s76_s15 }
  0x12   :  { %54 = vpow2.f32 %v27_v3 }
  0x13   :  { %p83_p8 = por %p82_p7, %p81_p6 }
  0x15   :  { %p84_p9 = pnand %p83_p8, %p77_p5 }
  0x1e   :  { %v53_v4 = vpop.eup %52 }
  0x1f   :  { %v55_v5 = vpop.eup %54  ;;  %29 = vst [vmem:[#allocation5] sm:$0xff] %v53_v4 }
  0x20   :  { %30 = vst [vmem:[#allocation5 + $0x8] sm:$0xff] %v55_v5 }
  0x21   :  { %87 = shalt.err (!%p84_p9)
}
  0x22   :  { %42 = dma.vmem_to_hbm [thread:$0]  %s37_s14, 256, %s121_s1, [#allocation4], %s101_s9, %s101_s9, %s102_s10  }
  0x23   :  { %98 = dma.done.wait [#allocation4], 256  }
  0x24   :  { %99 = vsyncadd [#allocation4], 4294967040 }
  0x25   :  { %46 = vsyncpa [#allocation3], 1 }
  0x26   :  { %47 = vsyncpa [#allocation4], 1 }

</bundles_post_ra>
